<compile_context>
chip_gen: v6e
topology: v6e:2x2x1
jax: 0.10.0
libtpu: 0.0.40
codegen_flags: <defaults>
</compile_context>

<pallas_src>
import functools

import jax
import jax.numpy as jnp
from jax.experimental import pallas as pl
from jax.experimental.pallas import tpu as pltpu

# --- constants mirroring the PyTorch `config` module -------------------------
N_CONV_LAYERS_IN_ONE_BLOCK = 2
BIAS = True


def _round_up(x, m):
    return ((x + m - 1) // m) * m


def _choose_l_tile(L, H, per_col_bytes, n_batch):
    """Lane-axis (sequence) tile: VMEM-budgeted, lane-dense, >=2 tiles if N==1."""
    if L <= 256:
        return L
    budget = 24 << 20                       # double-buffered working-set target
    tl = 128
    for cand in (1024, 512, 256, 128):
        if cand * per_col_bytes <= budget:
            tl = cand
            break
    if n_batch == 1:
        # guarantee >= 2 L tiles so both TensorCores on v7x get work
        tl = min(tl, max(128, _round_up(pl.cdiv(L, 2), 128)))
    if tl < H:                              # neighbour tile must supply the halo
        tl = _round_up(H, 128)
    if tl >= L:
        tl = L
    return tl


# --- fused two-layer dilated Conv1d + ReLU kernel (one (n, l_tile) per step) --
def _fused_convblock_kernel(*refs, K, dilation, pad, TL, OFF, num_lt,
                            z_last, z_prev, has_halo_input):
    if has_halo_input:
        (x_ref, halo_ref, w1_ref, b1_ref, w2_ref, b2_ref,
         o_ref, xext_ref, y1_ref) = refs
    else:
        (x_ref, w1_ref, b1_ref, w2_ref, b2_ref,
         o_ref, xext_ref, y1_ref) = refs
        halo_ref = None

    lt = pl.program_id(1)
    H = 2 * pad                      # fused two-layer input halo per side
    T1 = TL + 2 * pad                # extended layer-1 output length
    C_in = x_ref.shape[1]
    C_mid = w1_ref.shape[1]
    cdtype = xext_ref.dtype

    # ---- assemble the halo-extended input window (C_in, OFF+TL+H) in VMEM ---
    # interior lands at the 128-aligned offset OFF -> unmasked wide stores
    xext_ref[:, OFF:OFF + TL] = x_ref[0]
    if pad > 0:
        if has_halo_input:
            xext_ref[:, OFF - H:OFF] = halo_ref[0, 0, :, :H]
            xext_ref[:, OFF + TL:OFF + TL + H] = halo_ref[0, 0, :, H:]
        else:
            zeros = jnp.zeros((C_in, H), cdtype)
            xext_ref[:, OFF - H:OFF] = zeros
            xext_ref[:, OFF + TL:OFF + TL + H] = zeros

    # ---- layer 1: K accumulated MXU matmuls over the dilated taps (f32 acc) -
    s0 = OFF - H
    acc1 = jnp.dot(w1_ref[0], xext_ref[:, s0:s0 + T1],
                   preferred_element_type=jnp.float32)
    for k in range(1, K):
        s = s0 + k * dilation
        acc1 = acc1 + jnp.dot(w1_ref[k], xext_ref[:, s:s + T1],
                              preferred_element_type=jnp.float32)
    y1_ref[...] = jnp.maximum(acc1 + b1_ref[...], 0.0).astype(y1_ref.dtype)

    # ---- zero layer-1 activations that fall outside [0, L) ------------------
    # (this is the zero padding of the layer-1 output seen by layer 2, NOT
    #  relu(bias); only edge tiles pay, with static column counts)
    if pad > 0:
        @pl.when(lt == 0)
        def _():
            y1_ref[:, :pad] = jnp.zeros((C_mid, pad), y1_ref.dtype)
        if z_last > 0:
            @pl.when(lt == num_lt - 1)
            def _():
                y1_ref[:, T1 - z_last:] = jnp.zeros((C_mid, z_last), y1_ref.dtype)
        if z_prev > 0 and num_lt >= 2:
            @pl.when(lt == num_lt - 2)
            def _():
                y1_ref[:, T1 - z_prev:] = jnp.zeros((C_mid, z_prev), y1_ref.dtype)

    # ---- layer 2: K accumulated MXU matmuls + bias + ReLU, lane-dense store --
    acc2 = jnp.dot(w2_ref[0], y1_ref[:, 0:TL],
                   preferred_element_type=jnp.float32)
    for k in range(1, K):
        s = k * dilation
        acc2 = acc2 + jnp.dot(w2_ref[k], y1_ref[:, s:s + TL],
                              preferred_element_type=jnp.float32)
    o_ref[0] = jnp.maximum(acc2 + b2_ref[...], 0.0).astype(o_ref.dtype)


# --- ConvBlock parameter init (matches nn.Conv1d default uniform init bounds) -
def conv_block_init(key, in_ch, out_ch, kernel_size, bias=BIAS):
    params = []
    for _ in range(N_CONV_LAYERS_IN_ONE_BLOCK):
        key, wk, bk = jax.random.split(key, 3)
        bound = 1.0 / float(in_ch * kernel_size) ** 0.5
        w = jax.random.uniform(wk, (out_ch, in_ch, kernel_size),
                               jnp.float32, -bound, bound)
        b = (jax.random.uniform(bk, (out_ch,), jnp.float32, -bound, bound)
             if bias else None)
        params.append((w, b))
        in_ch = out_ch
    return params


def conv_block_apply(params, x_ncl, kernel_size, dilation=None, l_tile=None):
    """Forward pass of ConvBlock.  x_ncl: (N, C_in, L) -> (N, C_out, L).

    Matmul operands follow x_ncl.dtype (pass bf16 activations to reach the
    bf16 MXU rate on v6e/v7x); accumulation, bias add and ReLU stay in f32.
    """
    if dilation is None:
        dilation = kernel_size // 2 - 1 if kernel_size > 3 else 1
    K = kernel_size
    assert (dilation * (K - 1)) % 2 == 0, "kernel_size must be odd ('same' pad)"
    pad = dilation * (K - 1) // 2
    H = 2 * pad
    assert len(params) == 2, "fused kernel assumes N_CONV_LAYERS_IN_ONE_BLOCK==2"
    (w1, b1), (w2, b2) = params

    N, C_in, L = x_ncl.shape
    C_mid, C_out = w1.shape[0], w2.shape[0]
    dtype = x_ncl.dtype
    itemsize = jnp.dtype(dtype).itemsize

    # tap-major weight layout: (C_out, C_in, K) -> (K, C_out, C_in)
    w1f = jnp.transpose(w1, (2, 0, 1)).astype(dtype)
    w2f = jnp.transpose(w2, (2, 0, 1)).astype(dtype)
    # biases stay f32 and are added to the f32 accumulator
    b1c = (jnp.zeros((C_mid, 1), jnp.float32) if b1 is None
           else b1.reshape(C_mid, 1).astype(jnp.float32))
    b2c = (jnp.zeros((C_out, 1), jnp.float32) if b2 is None
           else b2.reshape(C_out, 1).astype(jnp.float32))

    # ---- lane (sequence) tiling: VMEM-budgeted, generation-aware ------------
    per_col_bytes = (3 * C_in * itemsize        # x block (x2 buffers) + xext
                     + 2 * C_out * itemsize     # output block (x2 buffers)
                     + C_mid * (itemsize + 4)   # y1 scratch + layer-1 f32 acc
                     + C_out * 4)               # layer-2 f32 accumulator
    TL = l_tile if l_tile is not None else _choose_l_tile(L, H, per_col_bytes, N)
    num_lt = pl.cdiv(L, TL)
    if num_lt > 1:
        assert TL >= H, "L tile must cover the fused conv halo"
    L_pad = num_lt * TL

    # zero tail pad (only when L is not a multiple of the chosen tile)
    x_p = x_ncl if L_pad == L else jnp.pad(
        x_ncl, ((0, 0), (0, 0), (0, L_pad - L)))

    # halo side input: for each L tile, the H input columns on either side
    # (explicit zeros at the sequence ends).  Tiny: ~2H/TL of x.
    has_halo_input = (pad > 0) and (num_lt > 1)
    if has_halo_input:
        xt = x_p.reshape(N, C_in, num_lt, TL)
        zeros_h = jnp.zeros((N, C_in, 1, H), dtype)
        left_halo = jnp.concatenate([zeros_h, xt[:, :, :-1, TL - H:]], axis=2)
        right_halo = jnp.concatenate([xt[:, :, 1:, :H], zeros_h], axis=2)
        halos = jnp.transpose(
            jnp.concatenate([left_halo, right_halo], axis=3), (0, 2, 1, 3))
    else:
        halos = None

    # interior lands 128-aligned inside the extended window when TL is lane-dense
    OFF = _round_up(H, 128) if (H > 0 and TL % 128 == 0) else H
    # static number of layer-1 columns at/after position L (last two tiles only)
    z_last = L_pad - L + pad
    z_prev = max(0, L_pad - TL + pad - L)

    # compiler hints: explicit VMEM limit + updated cost estimate
    weight_bytes = 2 * (w1f.size + w2f.size) * itemsize + 2 * (C_mid + C_out) * 4
    halo_bytes = 4 * C_in * 2 * H * itemsize
    est_vmem = (per_col_bytes * (TL + 2 * H + 2 * OFF)
                + weight_bytes + halo_bytes + (1 << 20))
    vmem_limit = int(min(48 << 20, max(32 << 20, 2 * est_vmem)))
    flops = 2 * N * L * K * (C_in * C_mid + C_mid * C_out)
    bytes_accessed = int(
        x_p.size * itemsize
        + (halos.size * itemsize if halos is not None else 0)
        + N * C_out * L_pad * itemsize
        + (w1f.size + w2f.size) * itemsize + (b1c.size + b2c.size) * 4)

    kernel = functools.partial(
        _fused_convblock_kernel, K=K, dilation=dilation, pad=pad, TL=TL,
        OFF=OFF, num_lt=num_lt, z_last=z_last, z_prev=z_prev,
        has_halo_input=has_halo_input)

    in_specs = [pl.BlockSpec((1, C_in, TL), lambda n, lt: (n, 0, lt))]
    args = [x_p]
    if has_halo_input:
        in_specs.append(
            pl.BlockSpec((1, 1, C_in, 2 * H), lambda n, lt: (n, lt, 0, 0)))
        args.append(halos)
    in_specs += [
        pl.BlockSpec((K, C_mid, C_in), lambda n, lt: (0, 0, 0)),
        pl.BlockSpec((C_mid, 1), lambda n, lt: (0, 0)),
        pl.BlockSpec((K, C_out, C_mid), lambda n, lt: (0, 0, 0)),
        pl.BlockSpec((C_out, 1), lambda n, lt: (0, 0)),
    ]
    args += [w1f, b1c, w2f, b2c]

    out = pl.pallas_call(
        kernel,
        out_shape=jax.ShapeDtypeStruct((N, C_out, L_pad), dtype),
        grid_spec=pltpu.PrefetchScalarGridSpec(
            num_scalar_prefetch=0,
            grid=(N, num_lt),
            in_specs=in_specs,
            out_specs=pl.BlockSpec((1, C_out, TL), lambda n, lt: (n, 0, lt)),
            scratch_shapes=[
                pltpu.VMEM((C_in, OFF + TL + H), dtype),      # halo-extended x
                pltpu.VMEM((C_mid, TL + 2 * pad), dtype),     # fused layer-1 act
            ]),
        compiler_params=pltpu.CompilerParams(
            dimension_semantics=("parallel", "parallel"),
            vmem_limit_bytes=vmem_limit),
        cost_estimate=pl.CostEstimate(
            flops=flops, transcendentals=0, bytes_accessed=bytes_accessed),
    )(*args)
    return out if L_pad == L else out[:, :, :L]


# --- pure-JAX reference (lax conv) for correctness check ----------------------
def conv_block_reference(params, x_ncl, kernel_size, dilation=None):
    if dilation is None:
        dilation = kernel_size // 2 - 1 if kernel_size > 3 else 1
    pad = dilation * (kernel_size - 1) // 2
    y = x_ncl
    for (w, b) in params:
        y = jax.lax.conv_general_dilated(
            y, w, window_strides=(1,), padding=[(pad, pad)],
            rhs_dilation=(dilation,),
            dimension_numbers=("NCH", "OIH", "NCH"))
        if b is not None:
            y = y + b[None, :, None]
        y = jnp.maximum(y, 0.0)
    return y


if __name__ == "__main__":
    key = jax.random.PRNGKey(0)

    # Test 1: small shapes consistent with the module (single L tile, f32).
    N, IN_CH, OUT_CH, L = 2, 4, 8, 16
    KERNEL_SIZE = 5                         # odd, >3 -> dilation = 5//2 - 1 = 1
    key, xk, pk = jax.random.split(key, 3)
    x = jax.random.normal(xk, (N, IN_CH, L), jnp.float32)    # PyTorch NCL layout
    params = conv_block_init(pk, IN_CH, OUT_CH, KERNEL_SIZE, bias=BIAS)
    out = jax.block_until_ready(conv_block_apply(params, x, KERNEL_SIZE))
    ref = conv_block_reference(params, x, KERNEL_SIZE)
    assert out.shape == (N, OUT_CH, L), out.shape
    assert jnp.allclose(out, ref, atol=1e-5, rtol=1e-5), "mismatch vs reference"

    # Test 2: longer sequence -> L-tiled path with neighbour halos (f32).
    N2, C2, L2, K2 = 1, 8, 2048, 3          # K=3 -> dilation=1, pad=1
    key, xk2, pk2 = jax.random.split(key, 3)
    x2 = jax.random.normal(xk2, (N2, C2, L2), jnp.float32)
    params2 = conv_block_init(pk2, C2, C2, K2, bias=BIAS)
    out2 = jax.block_until_ready(conv_block_apply(params2, x2, K2))
    ref2 = conv_block_reference(params2, x2, K2)
    assert out2.shape == (N2, C2, L2), out2.shape
    assert jnp.allclose(out2, ref2, atol=1e-4, rtol=1e-4), "tiled mismatch"

    # Test 3: bf16 matmul operands (f32 accumulate) vs f32 reference.
    N3, C3, L3, K3 = 2, 16, 512, 5
    key, xk3, pk3 = jax.random.split(key, 3)
    x3 = jax.random.normal(xk3, (N3, C3, L3), jnp.float32)
    params3 = conv_block_init(pk3, C3, C3, K3, bias=BIAS)
    out3 = jax.block_until_ready(
        conv_block_apply(params3, x3.astype(jnp.bfloat16), K3))
    ref3 = conv_block_reference(params3, x3, K3)
    assert out3.shape == (N3, C3, L3), out3.shape
    assert jnp.allclose(out3.astype(jnp.float32), ref3, atol=5e-2, rtol=5e-2), \
        "bf16 mismatch"

    # Test 4: non-divisible L (zero tail pad + masked last tiles), forced tiling.
    N4, C4, L4, K4 = 1, 8, 1025, 5
    key, xk4, pk4 = jax.random.split(key, 3)
    x4 = jax.random.normal(xk4, (N4, C4, L4), jnp.float32)
    params4 = conv_block_init(pk4, C4, C4, K4, bias=BIAS)
    out4 = jax.block_until_ready(conv_block_apply(params4, x4, K4, l_tile=512))
    ref4 = conv_block_reference(params4, x4, K4)
    assert out4.shape == (N4, C4, L4), out4.shape
    assert jnp.allclose(out4, ref4, atol=1e-4, rtol=1e-4), "tail-tile mismatch"

    print("KERNEL_OK")
</pallas_src>

<mosaic_0001>
module attributes {stable_mosaic.version = 11 : i64} {
  func.func @_fused_convblock_kernel(%arg0: i32, %arg1: i32, %arg2: memref<1x4x16xf32, #tpu.memory_space<vmem>>, %arg3: memref<5x8x4xf32, #tpu.memory_space<vmem>>, %arg4: memref<8x1xf32, #tpu.memory_space<vmem>>, %arg5: memref<5x8x8xf32, #tpu.memory_space<vmem>>, %arg6: memref<8x1xf32, #tpu.memory_space<vmem>>, %arg7: memref<1x8x16xf32, #tpu.memory_space<vmem>>, %arg8: memref<4x24xf32, #tpu.memory_space<vmem>>, %arg9: memref<8x20xf32, #tpu.memory_space<vmem>>) attributes {dimension_semantics = [#tpu.dimension_semantics<parallel>, #tpu.dimension_semantics<parallel>], iteration_bounds = array<i64: 2, 1>, scalar_prefetch = 0 : i64, scratch_operands = 2 : i64, tpu.core_type = #tpu.core_type<tc>, window_params = [{transform_indices = @transform_0, window_bounds = array<i64: 1, 4, 16>}, {pipeline_mode = #tpu.pipeline_mode<synchronous>, transform_indices = @transform_1, window_bounds = array<i64: 5, 8, 4>}, {pipeline_mode = #tpu.pipeline_mode<synchronous>, transform_indices = @transform_2, window_bounds = array<i64: 8, 1>}, {pipeline_mode = #tpu.pipeline_mode<synchronous>, transform_indices = @transform_3, window_bounds = array<i64: 5, 8, 8>}, {pipeline_mode = #tpu.pipeline_mode<synchronous>, transform_indices = @transform_4, window_bounds = array<i64: 8, 1>}, {transform_indices = @transform_5, window_bounds = array<i64: 1, 8, 16>}]} {
    %c0 = arith.constant 0 : index
    %c0_0 = arith.constant 0 : index
    %c0_1 = arith.constant 0 : index
    %0 = vector.load %arg2[%c0, %c0_0, %c0_1] : memref<1x4x16xf32, #tpu.memory_space<vmem>>, vector<1x4x16xf32>
    %1 = vector.shape_cast %0 : vector<1x4x16xf32> to vector<4x16xf32>
    %c0_2 = arith.constant 0 : index
    %c4 = arith.constant 4 : index
    %2 = vector.load %arg8[%c0_2, %c4] : memref<4x24xf32, #tpu.memory_space<vmem>>, vector<4x16xf32>
    tpu.vector_store %arg8[%c0_2, %c4], %1 {strides = array<i32>} : memref<4x24xf32, #tpu.memory_space<vmem>>, vector<4x16xf32>,
    %cst = arith.constant 0.000000e+00 : f32
    %3 = vector.broadcast %cst : f32 to vector<4x4xf32>
    %c0_3 = arith.constant 0 : index
    %c0_4 = arith.constant 0 : index
    %4 = vector.load %arg8[%c0_3, %c0_4] : memref<4x24xf32, #tpu.memory_space<vmem>>, vector<4x4xf32>
    tpu.vector_store %arg8[%c0_3, %c0_4], %3 {strides = array<i32>} : memref<4x24xf32, #tpu.memory_space<vmem>>, vector<4x4xf32>,
    %c0_5 = arith.constant 0 : index
    %c20 = arith.constant 20 : index
    %5 = vector.load %arg8[%c0_5, %c20] : memref<4x24xf32, #tpu.memory_space<vmem>>, vector<4x4xf32>
    tpu.vector_store %arg8[%c0_5, %c20], %3 {strides = array<i32>} : memref<4x24xf32, #tpu.memory_space<vmem>>, vector<4x4xf32>,
    %c0_6 = arith.constant 0 : index
    %c0_7 = arith.constant 0 : index
    %c0_8 = arith.constant 0 : index
    %6 = vector.load %arg3[%c0_6, %c0_7, %c0_8] : memref<5x8x4xf32, #tpu.memory_space<vmem>>, vector<1x8x4xf32>
    %7 = vector.shape_cast %6 : vector<1x8x4xf32> to vector<8x4xf32>
    %c0_9 = arith.constant 0 : index
    %c0_10 = arith.constant 0 : index
    %8 = vector.load %arg8[%c0_9, %c0_10] : memref<4x24xf32, #tpu.memory_space<vmem>>, vector<4x20xf32>
    %cst_11 = arith.constant dense<0.000000e+00> : vector<8x20xf32>
    %9 = tpu.matmul %7, %8, %cst_11 {dimension_numbers = #tpu.dot_dimension_numbers<[1], [0], [0], [1], [0, 0, 1, 1], [], []>} : vector<8x4xf32>, vector<4x20xf32>, vector<8x20xf32> -> vector<8x20xf32>
    %c1 = arith.constant 1 : index
    %c0_12 = arith.constant 0 : index
    %c0_13 = arith.constant 0 : index
    %10 = vector.load %arg3[%c1, %c0_12, %c0_13] : memref<5x8x4xf32, #tpu.memory_space<vmem>>, vector<1x8x4xf32>
    %11 = vector.shape_cast %10 : vector<1x8x4xf32> to vector<8x4xf32>
    %c0_14 = arith.constant 0 : index
    %c1_15 = arith.constant 1 : index
    %12 = vector.load %arg8[%c0_14, %c1_15] : memref<4x24xf32, #tpu.memory_space<vmem>>, vector<4x20xf32>
    %cst_16 = arith.constant dense<0.000000e+00> : vector<8x20xf32>
    %13 = tpu.matmul %11, %12, %cst_16 {dimension_numbers = #tpu.dot_dimension_numbers<[1], [0], [0], [1], [0, 0, 1, 1], [], []>} : vector<8x4xf32>, vector<4x20xf32>, vector<8x20xf32> -> vector<8x20xf32>
    %14 = arith.addf %9, %13 : vector<8x20xf32>
    %c2 = arith.constant 2 : index
    %c0_17 = arith.constant 0 : index
    %c0_18 = arith.constant 0 : index
    %15 = vector.load %arg3[%c2, %c0_17, %c0_18] : memref<5x8x4xf32, #tpu.memory_space<vmem>>, vector<1x8x4xf32>
    %16 = vector.shape_cast %15 : vector<1x8x4xf32> to vector<8x4xf32>
    %c0_19 = arith.constant 0 : index
    %c2_20 = arith.constant 2 : index
    %17 = vector.load %arg8[%c0_19, %c2_20] : memref<4x24xf32, #tpu.memory_space<vmem>>, vector<4x20xf32>
    %cst_21 = arith.constant dense<0.000000e+00> : vector<8x20xf32>
    %18 = tpu.matmul %16, %17, %cst_21 {dimension_numbers = #tpu.dot_dimension_numbers<[1], [0], [0], [1], [0, 0, 1, 1], [], []>} : vector<8x4xf32>, vector<4x20xf32>, vector<8x20xf32> -> vector<8x20xf32>
    %19 = arith.addf %14, %18 : vector<8x20xf32>
    %c3 = arith.constant 3 : index
    %c0_22 = arith.constant 0 : index
    %c0_23 = arith.constant 0 : index
    %20 = vector.load %arg3[%c3, %c0_22, %c0_23] : memref<5x8x4xf32, #tpu.memory_space<vmem>>, vector<1x8x4xf32>
    %21 = vector.shape_cast %20 : vector<1x8x4xf32> to vector<8x4xf32>
    %c0_24 = arith.constant 0 : index
    %c3_25 = arith.constant 3 : index
    %22 = vector.load %arg8[%c0_24, %c3_25] : memref<4x24xf32, #tpu.memory_space<vmem>>, vector<4x20xf32>
    %cst_26 = arith.constant dense<0.000000e+00> : vector<8x20xf32>
    %23 = tpu.matmul %21, %22, %cst_26 {dimension_numbers = #tpu.dot_dimension_numbers<[1], [0], [0], [1], [0, 0, 1, 1], [], []>} : vector<8x4xf32>, vector<4x20xf32>, vector<8x20xf32> -> vector<8x20xf32>
    %24 = arith.addf %19, %23 : vector<8x20xf32>
    %c4_27 = arith.constant 4 : index
    %c0_28 = arith.constant 0 : index
    %c0_29 = arith.constant 0 : index
    %25 = vector.load %arg3[%c4_27, %c0_28, %c0_29] : memref<5x8x4xf32, #tpu.memory_space<vmem>>, vector<1x8x4xf32>
    %26 = vector.shape_cast %25 : vector<1x8x4xf32> to vector<8x4xf32>
    %c0_30 = arith.constant 0 : index
    %c4_31 = arith.constant 4 : index
    %27 = vector.load %arg8[%c0_30, %c4_31] : memref<4x24xf32, #tpu.memory_space<vmem>>, vector<4x20xf32>
    %cst_32 = arith.constant dense<0.000000e+00> : vector<8x20xf32>
    %28 = tpu.matmul %26, %27, %cst_32 {dimension_numbers = #tpu.dot_dimension_numbers<[1], [0], [0], [1], [0, 0, 1, 1], [], []>} : vector<8x4xf32>, vector<4x20xf32>, vector<8x20xf32> -> vector<8x20xf32>
    %29 = arith.addf %24, %28 : vector<8x20xf32>
    %c0_33 = arith.constant 0 : index
    %c0_34 = arith.constant 0 : index
    %30 = vector.load %arg4[%c0_33, %c0_34] : memref<8x1xf32, #tpu.memory_space<vmem>>, vector<8x1xf32>
    %31 = vector.broadcast %30 : vector<8x1xf32> to vector<8x20xf32>
    %32 = arith.addf %29, %31 : vector<8x20xf32>
    %cst_35 = arith.constant 0.000000e+00 : f32
    %33 = vector.broadcast %cst_35 : f32 to vector<8x20xf32>
    %34 = arith.maximumf %32, %33 : vector<8x20xf32>
    %c0_36 = arith.constant 0 : index
    %c0_37 = arith.constant 0 : index
    %35 = vector.load %arg9[%c0_36, %c0_37] : memref<8x20xf32, #tpu.memory_space<vmem>>, vector<8x20xf32>
    tpu.vector_store %arg9[%c0_36, %c0_37], %34 {strides = array<i32>} : memref<8x20xf32, #tpu.memory_space<vmem>>, vector<8x20xf32>,
    %c0_i32 = arith.constant 0 : i32
    %36 = arith.cmpi eq, %arg1, %c0_i32 : i32
    %37 = arith.extui %36 : i1 to i32
    %c0_i32_38 = arith.constant 0 : i32
    %38 = arith.cmpi ne, %37, %c0_i32_38 : i32
    scf.if %38 {
      %cst_77 = arith.constant 0.000000e+00 : f32
      %74 = vector.broadcast %cst_77 : f32 to vector<8x2xf32>
      %c0_78 = arith.constant 0 : index
      %c0_79 = arith.constant 0 : index
      %75 = vector.load %arg9[%c0_78, %c0_79] : memref<8x20xf32, #tpu.memory_space<vmem>>, vector<8x2xf32>
      tpu.vector_store %arg9[%c0_78, %c0_79], %74 {strides = array<i32>} : memref<8x20xf32, #tpu.memory_space<vmem>>, vector<8x2xf32>,
    } else {
    }
    %c0_i32_39 = arith.constant 0 : i32
    %39 = arith.cmpi eq, %arg1, %c0_i32_39 : i32
    %40 = arith.extui %39 : i1 to i32
    %c0_i32_40 = arith.constant 0 : i32
    %41 = arith.cmpi ne, %40, %c0_i32_40 : i32
    scf.if %41 {
      %cst_77 = arith.constant 0.000000e+00 : f32
      %74 = vector.broadcast %cst_77 : f32 to vector<8x2xf32>
      %c0_78 = arith.constant 0 : index
      %c18 = arith.constant 18 : index
      %75 = vector.load %arg9[%c0_78, %c18] : memref<8x20xf32, #tpu.memory_space<vmem>>, vector<8x2xf32>
      tpu.vector_store %arg9[%c0_78, %c18], %74 {strides = array<i32>} : memref<8x20xf32, #tpu.memory_space<vmem>>, vector<8x2xf32>,
    } else {
    }
    %c0_41 = arith.constant 0 : index
    %c0_42 = arith.constant 0 : index
    %c0_43 = arith.constant 0 : index
    %42 = vector.load %arg5[%c0_41, %c0_42, %c0_43] : memref<5x8x8xf32, #tpu.memory_space<vmem>>, vector<1x8x8xf32>
    %43 = vector.shape_cast %42 : vector<1x8x8xf32> to vector<8x8xf32>
    %c0_44 = arith.constant 0 : index
    %c0_45 = arith.constant 0 : index
    %44 = vector.load %arg9[%c0_44, %c0_45] : memref<8x20xf32, #tpu.memory_space<vmem>>, vector<8x16xf32>
    %cst_46 = arith.constant dense<0.000000e+00> : vector<8x16xf32>
    %45 = tpu.matmul %43, %44, %cst_46 {dimension_numbers = #tpu.dot_dimension_numbers<[1], [0], [0], [1], [0, 0, 1, 1], [], []>} : vector<8x8xf32>, vector<8x16xf32>, vector<8x16xf32> -> vector<8x16xf32>
    %c1_47 = arith.constant 1 : index
    %c0_48 = arith.constant 0 : index
    %c0_49 = arith.constant 0 : index
    %46 = vector.load %arg5[%c1_47, %c0_48, %c0_49] : memref<5x8x8xf32, #tpu.memory_space<vmem>>, vector<1x8x8xf32>
    %47 = vector.shape_cast %46 : vector<1x8x8xf32> to vector<8x8xf32>
    %c0_50 = arith.constant 0 : index
    %c1_51 = arith.constant 1 : index
    %48 = vector.load %arg9[%c0_50, %c1_51] : memref<8x20xf32, #tpu.memory_space<vmem>>, vector<8x16xf32>
    %cst_52 = arith.constant dense<0.000000e+00> : vector<8x16xf32>
    %49 = tpu.matmul %47, %48, %cst_52 {dimension_numbers = #tpu.dot_dimension_numbers<[1], [0], [0], [1], [0, 0, 1, 1], [], []>} : vector<8x8xf32>, vector<8x16xf32>, vector<8x16xf32> -> vector<8x16xf32>
    %50 = arith.addf %45, %49 : vector<8x16xf32>
    %c2_53 = arith.constant 2 : index
    %c0_54 = arith.constant 0 : index
    %c0_55 = arith.constant 0 : index
    %51 = vector.load %arg5[%c2_53, %c0_54, %c0_55] : memref<5x8x8xf32, #tpu.memory_space<vmem>>, vector<1x8x8xf32>
    %52 = vector.shape_cast %51 : vector<1x8x8xf32> to vector<8x8xf32>
    %c0_56 = arith.constant 0 : index
    %c2_57 = arith.constant 2 : index
    %53 = vector.load %arg9[%c0_56, %c2_57] : memref<8x20xf32, #tpu.memory_space<vmem>>, vector<8x16xf32>
    %cst_58 = arith.constant dense<0.000000e+00> : vector<8x16xf32>
    %54 = tpu.matmul %52, %53, %cst_58 {dimension_numbers = #tpu.dot_dimension_numbers<[1], [0], [0], [1], [0, 0, 1, 1], [], []>} : vector<8x8xf32>, vector<8x16xf32>, vector<8x16xf32> -> vector<8x16xf32>
    %55 = arith.addf %50, %54 : vector<8x16xf32>
    %c3_59 = arith.constant 3 : index
    %c0_60 = arith.constant 0 : index
    %c0_61 = arith.constant 0 : index
    %56 = vector.load %arg5[%c3_59, %c0_60, %c0_61] : memref<5x8x8xf32, #tpu.memory_space<vmem>>, vector<1x8x8xf32>
    %57 = vector.shape_cast %56 : vector<1x8x8xf32> to vector<8x8xf32>
    %c0_62 = arith.constant 0 : index
    %c3_63 = arith.constant 3 : index
    %58 = vector.load %arg9[%c0_62, %c3_63] : memref<8x20xf32, #tpu.memory_space<vmem>>, vector<8x16xf32>
    %cst_64 = arith.constant dense<0.000000e+00> : vector<8x16xf32>
    %59 = tpu.matmul %57, %58, %cst_64 {dimension_numbers = #tpu.dot_dimension_numbers<[1], [0], [0], [1], [0, 0, 1, 1], [], []>} : vector<8x8xf32>, vector<8x16xf32>, vector<8x16xf32> -> vector<8x16xf32>
    %60 = arith.addf %55, %59 : vector<8x16xf32>
    %c4_65 = arith.constant 4 : index
    %c0_66 = arith.constant 0 : index
    %c0_67 = arith.constant 0 : index
    %61 = vector.load %arg5[%c4_65, %c0_66, %c0_67] : memref<5x8x8xf32, #tpu.memory_space<vmem>>, vector<1x8x8xf32>
    %62 = vector.shape_cast %61 : vector<1x8x8xf32> to vector<8x8xf32>
    %c0_68 = arith.constant 0 : index
    %c4_69 = arith.constant 4 : index
    %63 = vector.load %arg9[%c0_68, %c4_69] : memref<8x20xf32, #tpu.memory_space<vmem>>, vector<8x16xf32>
    %cst_70 = arith.constant dense<0.000000e+00> : vector<8x16xf32>
    %64 = tpu.matmul %62, %63, %cst_70 {dimension_numbers = #tpu.dot_dimension_numbers<[1], [0], [0], [1], [0, 0, 1, 1], [], []>} : vector<8x8xf32>, vector<8x16xf32>, vector<8x16xf32> -> vector<8x16xf32>
    %65 = arith.addf %60, %64 : vector<8x16xf32>
    %c0_71 = arith.constant 0 : index
    %c0_72 = arith.constant 0 : index
    %66 = vector.load %arg6[%c0_71, %c0_72] : memref<8x1xf32, #tpu.memory_space<vmem>>, vector<8x1xf32>
    %67 = vector.broadcast %66 : vector<8x1xf32> to vector<8x16xf32>
    %68 = arith.addf %65, %67 : vector<8x16xf32>
    %cst_73 = arith.constant 0.000000e+00 : f32
    %69 = vector.broadcast %cst_73 : f32 to vector<8x16xf32>
    %70 = arith.maximumf %68, %69 : vector<8x16xf32>
    %c0_74 = arith.constant 0 : index
    %c0_75 = arith.constant 0 : index
    %c0_76 = arith.constant 0 : index
    %71 = vector.load %arg7[%c0_74, %c0_75, %c0_76] : memref<1x8x16xf32, #tpu.memory_space<vmem>>, vector<1x8x16xf32>
    %72 = vector.shape_cast %71 : vector<1x8x16xf32> to vector<8x16xf32>
    %73 = vector.shape_cast %70 : vector<8x16xf32> to vector<1x8x16xf32>
    tpu.vector_store %arg7[%c0_74, %c0_75, %c0_76], %73 {strides = array<i32>} : memref<1x8x16xf32, #tpu.memory_space<vmem>>, vector<1x8x16xf32>,
    return
  }
  func.func @transform_0(%arg0: i32, %arg1: i32) -> (i32, i32, i32) {
    %c0_i32 = arith.constant 0 : i32
    %c0_i32_0 = arith.constant 0 : i32
    return %arg0, %c0_i32, %arg1 : i32, i32, i32
  }
  func.func @transform_1(%arg0: i32, %arg1: i32) -> (i32, i32, i32) {
    %c0_i32 = arith.constant 0 : i32
    %c0_i32_0 = arith.constant 0 : i32
    %c0_i32_1 = arith.constant 0 : i32
    %c0_i32_2 = arith.constant 0 : i32
    return %c0_i32, %c0_i32_0, %c0_i32_1 : i32, i32, i32
  }
  func.func @transform_2(%arg0: i32, %arg1: i32) -> (i32, i32) {
    %c0_i32 = arith.constant 0 : i32
    %c0_i32_0 = arith.constant 0 : i32
    %c0_i32_1 = arith.constant 0 : i32
    return %c0_i32, %c0_i32_0 : i32, i32
  }
  func.func @transform_3(%arg0: i32, %arg1: i32) -> (i32, i32, i32) {
    %c0_i32 = arith.constant 0 : i32
    %c0_i32_0 = arith.constant 0 : i32
    %c0_i32_1 = arith.constant 0 : i32
    %c0_i32_2 = arith.constant 0 : i32
    return %c0_i32, %c0_i32_0, %c0_i32_1 : i32, i32, i32
  }
  func.func @transform_4(%arg0: i32, %arg1: i32) -> (i32, i32) {
    %c0_i32 = arith.constant 0 : i32
    %c0_i32_0 = arith.constant 0 : i32
    %c0_i32_1 = arith.constant 0 : i32
    return %c0_i32, %c0_i32_0 : i32, i32
  }
  func.func @transform_5(%arg0: i32, %arg1: i32) -> (i32, i32, i32) {
    %c0_i32 = arith.constant 0 : i32
    %c0_i32_0 = arith.constant 0 : i32
    return %arg0, %c0_i32, %arg1 : i32, i32, i32
  }
}

</mosaic_0001>

<bundles_post_ra>
// kernel: tpu_custom_call.1
= control target key start
LH: loop header
LB: loop body
LE: loop exit
PB: predicated region body
PF: predicated region fallthrough
CT: control target
= control target key end

     0   :  { %10 = vsyncpa [#allocation5], 0  ;;  %s1639_s0 = inlined_call_operand.vmem [shape: f32[2,4,16], index: 0, kind: input, shape index: {}]   ;;  %s1640_s1 = inlined_call_operand.vmem [shape: f32[5,8,4], index: 1, kind: input, shape index: {}]   ;;  %s1641_s2 = inlined_call_operand.vmem [shape: f32[8,1], index: 2, kind: input, shape index: {}]   ;;  %s1642_s3 = inlined_call_operand.vmem [shape: f32[5,8,8], index: 3, kind: input, shape index: {}]   ;;  %s1643_s4 = inlined_call_operand.vmem [shape: f32[8,1], index: 4, kind: input, shape index: {}]   ;;  %s1644_s5 = inlined_call_operand.hbm [shape: f32[2,8,16], index: 5, kind: output, shape index: {}]  }
   0x1   :  { %12 = vsyncpa [#allocation5 + $0x1], 0  ;;  %s1447_s18 = smov 0   ;;  %s1449_s19 = smov 0  }
   0x2   :  { %s1451_s20 = smov 0   ;;  %s1453_s21 = smov 0  }
   0x3   :  { %s1455_s22 = smov 0   ;;  %s1457_s23 = smov 0  }
   0x4 LB: > { %s1161_s24 = sadd.s32 4294967295, %s1406_s23   ;;  %s1162_s25 = sadd.s32 4294967294, %s1406_s23   ;;  %s1406_s23 = sphi %s1457_s23, %s18_s23   ;;  %s1402_s22 = sphi %s1455_s22, %s1651_s22   ;;  %s1398_s21 = sphi %s1453_s21, %s1650_s21   ;;  %s1394_s20 = sphi %s1451_s20, %s1649_s20   ;;  %s1390_s19 = sphi %s1449_s19, %s1648_s19   ;;  %s1386_s18 = sphi %s1447_s18, %s1647_s18  }
   0x5   : > { %s30_s26 = sadd.s32 1, %s1402_s22  ;;  %s151_s27 = sadd.s32 1, %s1394_s20 }
   0x6   : > { %p32_p0 = scmp.ge.s32.totalorder %s30_s26, 2  ;;  %p161_p1 = scmp.ne.s32.totalorder %s1394_s20, %s1390_s19 }
   0x7   : > { %p162_p2 = scmp.eq.s32.totalorder %s1161_s24, 1  ;;  %p167_p3 = scmp.ne.s32.totalorder %s1390_s19, %s1386_s18 }
   0x8   : > { %s1653_s26 = smov (%p32_p0, %s30_s26), 0  ;;  %p168_p5 = scmp.eq.s32.totalorder %s1162_s25, 1 }
   0x9   : > { %p1487_p4 = por %p162_p2, %p161_p1  ;;  %s146_s29 = ssub.s32 %s1402_s22, %s1653_s26 }
   0xa   : > { %p1165_p6 = scmp.ge.s32.totalorder %s1406_s23, 1  ;;  %p149_p7 = scmp.eq.s32.totalorder %s146_s29, 0 }
   0xb   : > { %p1494_p8 = por %p168_p5, %p167_p3  ;;  %p208_p9 = scmp.lt.s32.totalorder %s1406_s23, 3 }
   0xc   : > { %s1500_s6 = scalar_select %p149_p7, %s1394_s20, %s151_s27  }
   0xd   : > { %p209_p10 = pnand %p1165_p6, %p208_p9 }
   0xe   : > { %p238_p11 = scmp.lt.s32.totalorder (!%p209_p10), %s1398_s21, 1  ;;  %s1409_s12 = smov (!%p209_p10), 4  }
   0xf   : > { %212 = sbr.rel (%p209_p10) target bundleno = 819 (0x333), region = 40  ;;  %s1412_s15 = smov (!%p209_p10), 126  }
  0x10   : > { %s1413_s16 = smov (!%p209_p10), 127   ;;  %s1414_s17 = smov (!%p209_p10), 125  }
  0x11   : > { %s1415_s24 = smov (!%p209_p10), 124   ;;  %s1192_s13 = sshll.u32 (!%p209_p10), %s1398_s21, 7 }
  0x14   : > { %v1408_v0 = vmov 0.0   ;;  %s239_s7 = scalar_select %p238_p11, %s1398_s21, 1  ;;  %vm250_vm0 = vcmask 158752   ;;  %vm1410_vm1 = vmmov 0   ;;  %vm252_vm2 = vcmask 27648   ;;  %v256_v5 = vld [vmem:[%s1640_s1] sm:$0xff] }
  0x15   : > { %1215 = vmatprep.subr.mxu0 %v1408_v0  ;;  %1220 = vmatprep.subr.mxu1 %v1408_v0  ;;  %vm254_vm3 = vcmask 191648   ;;  %v1411_v3 = vmov 0   ;;  %vm267_vm4 = vcmask 1043456   ;;  %vm263_vm5 = vcmask 31744   ;;  %v655_v6 = vld [vmem:[%s1641_s2] sm:$0xff]  ;;  %v1168_v7 = vld [vmem:[%s1640_s1 + $0x8] sm:$0xff] }
  0x16   : > { %s1167_s8 = sshll.u32 %s239_s7, 2  ;;  %1217 = vmatprep.mubr.msk.f32.mxu0 %vm1410_vm1, %v1408_v0  ;;  %1222 = vmatprep.mubr.msk.f32.mxu1 %vm1410_vm1, %v1408_v0  ;;  %v1173_v10 = vld [vmem:[%s1640_s1 + $0x10] sm:$0xff]  ;;  %v1176_v11 = vld [vmem:[%s1640_s1 + $0x18] sm:$0xff]  ;;  %v1179_v14 = vld [vmem:[%s1640_s1 + $0x20] sm:$0xff]  ;;  %vm663_vm6 = vcmask 162816   ;;  %vm669_vm7 = vcmask 15360  }
  0x17   : > { %s244_s11 = scalar_lea.vmem %s1639_s0, %s1167_s8  ;;  %1328 = vset.pattern.permute.xlu1 %v1411_v3  ;;  %1329 = vset.pattern.permute.xlu0 %v1411_v3  ;;  %vm671_vm8 = vcmask 162960   ;;  %vm681_vm9 = vcmask 64512   ;;  %v673_v33 = vld [vmem:[%s1642_s3] sm:$0xff]  ;;  %v1182_v35 = vld [vmem:[%s1642_s3 + $0x8] sm:$0xff]  ;;  %v1185_v38 = vld [vmem:[%s1642_s3 + $0x10] sm:$0xff]  ;;  %vm1073_vm10 = vcmask 130048  }
  0x18   : > { %v245_v1 = vld [vmem:[%s244_s11] sm:$0xf]  ;;  %v1187_v39 = vld [vmem:[%s1642_s3 + $0x18] sm:$0xff]  ;;  %s235_s11 = sand.u32 1, %s1390_s19  }
  0x19   : > { %247 = vrot.lane.b32.xlu0 %v245_v1, %s1409_s12  ;;  %v1065_v34 = vld [vmem:[%s1643_s4] sm:$0xff]  ;;  %s1166_s12 = sshll.u32 %s235_s11, 3  ;;  %s1076_s7 = scalar_lea.sflag [#allocation5], %s235_s11 }
  0x1a   : > { %v1189_v42 = vld [vmem:[%s1642_s3 + $0x20] sm:$0xff]  ;;  %s237_s14 = scalar_lea.vmem [#allocation4], %s1166_s12 }
  0x1b   : > { %s1090_s25 = sshll.u32 %s237_s14, 4  ;;  %s1091_s25 = int_to_ptr.vmem [resolvable:$true] %s1090_s25 }
  0x8b   : > { %v248_v2 = vpop.permute.xlu0 %247 }
  0x8c   : > { %251 = vst.msk [vmem:[#allocation2] sm:$0xf] %vm250_vm0, %v248_v2 }
  0x8d   : > { %253 = vst.msk [vmem:[#allocation2] sm:$0xf] %vm252_vm2, %v1408_v0 }
  0x8e   : > { %255 = vst.msk [vmem:[#allocation2] sm:$0xf] %vm254_vm3, %v1408_v0 }
  0x95   : > { %v257_v4 = vld [vmem:[#allocation2] sm:$0xf] }
  0x96   : > { %417 = vrot.lane.b32.xlu1 %v257_v4, %s1412_s15  ;;  %261 = vrot.lane.b32.xlu0 %v257_v4, %s1413_s16 }
  0x97   : > { %1221 = vmatpush3.msk.msra.mxu1 %vm267_vm4, %v257_v4 }
  0x98   : > { %1223 = vmatmul.mubr.msk.f32.vlgmr.msra.gmra.mxu1 %vm263_vm5, %v256_v5  ;;  %1230 = vmatprep.subr.mxu1 %v1408_v0 }
  0x99   : > { %1232 = vmatprep.mubr.msk.f32.mxu1 %vm1410_vm1, %v1408_v0 }
  0x9a   : > { %497 = vrot.lane.b32.xlu1 %v257_v4, %s1414_s17  ;;  %577 = vrot.lane.b32.xlu0 %v257_v4, %s1415_s24 }
  0x9e   : > { %658 = vperm.xlu1 %1328, %v655_v6  }
 0x108   : > { %v418_v8 = vpop.permute.xlu1 %417  ;;  %v262_v9 = vpop.permute.xlu0 %261 }
 0x109   : > { %1216 = vmatpush3.msk.msra.mxu0 %vm267_vm4, %v262_v9 }
 0x10a   : > { %1218 = vmatmul.mubr.msk.f32.vlgmr.msra.gmra.mxu0 %vm263_vm5, %v1168_v7  ;;  %1225 = vmatprep.subr.mxu0 %v1408_v0 }
 0x10b   : > { %1226 = vmatpush3.msk.msra.mxu0 %vm267_vm4, %v418_v8  ;;  %1227 = vmatprep.mubr.msk.f32.mxu0 %vm1410_vm1, %v1408_v0 }
 0x10c   : > { %v498_v12 = vpop.permute.xlu1 %497  ;;  %1235 = vmatprep.subr.mxu0 %v1408_v0  ;;  %v578_v13 = vpop.permute.xlu0 %577 }
 0x10d   : > { %1231 = vmatpush3.msk.msra.mxu1 %vm267_vm4, %v498_v12 }
 0x10e   : > { %1228 = vmatmul.mubr.msk.f32.vlgmr.msra.gmra.mxu0 %vm263_vm5, %v1173_v10  ;;  %1233 = vmatmul.mubr.msk.f32.vlgmr.msra.gmra.mxu1 %vm263_vm5, %v1176_v11 }
 0x10f   : > { %1236 = vmatpush3.msk.msra.mxu0 %vm267_vm4, %v578_v13  ;;  %1237 = vmatprep.mubr.msk.f32.mxu0 %vm1410_vm1, %v1408_v0 }
 0x110   : > { %1240 = vmatprep.subr.mxu1 %v1408_v0  ;;  %1242 = vmatprep.mubr.msk.f32.mxu1 %vm1410_vm1, %v1408_v0 }
 0x111   : > { %1245 = vmatprep.subr.mxu0 %v1408_v0 }
 0x112   : > { %1238 = vmatmul.mubr.msk.f32.vlgmr.msra.gmra.mxu0 %vm263_vm5, %v1179_v14 }
 0x113   : > { %1247 = vmatprep.mubr.msk.f32.mxu0 %vm1410_vm1, %v1408_v0 }
 0x119   : > { %v659_v27 = vpop.permute.xlu1 %658 }
 0x158   : > { %v411_v15 = vpop.f32.mrf.mxu1 }
 0x15a   : > { %v1224_v16 = vpop.f32.mrf.mxu1 }
 0x1ca   : > { %v336_v17 = vpop.f32.mrf.mxu0 }
 0x1cb   : > { %v412_v19 = vadd.f32 %v411_v15, %v336_v17 }
 0x1cc   : > { %v1219_v18 = vpop.f32.mrf.mxu0 }
 0x1ce   : > { %v490_v20 = vpop.f32.mrf.mxu0  ;;  %v570_v21 = vpop.f32.mrf.mxu1 }
 0x1cf   : > { %v494_v22 = vadd.f32 %v490_v20, %v412_v19 }
 0x1d0   : > { %v1229_v23 = vpop.f32.mrf.mxu0  ;;  %v1234_v24 = vpop.f32.mrf.mxu1 }
 0x1d1   : > { %v574_v25 = vadd.f32 %v570_v21, %v494_v22 }
 0x1d2   : > { %v650_v26 = vpop.f32.mrf.mxu0 }
 0x1d3   : > { %v654_v28 = vadd.f32 %v650_v26, %v574_v25 }
 0x1d4   : > { %v1239_v29 = vpop.f32.mrf.mxu0 }
 0x1d5   : > { %v661_v30 = vadd.f32 %v659_v27, %v654_v28 }
 0x1d7   : > { %v662_v31 = vmax.f32 %v661_v30, 0.0 }
 0x1d9   : > { %664 = vst.msk [vmem:[#allocation3] sm:$0xff] %vm663_vm6, %v662_v31 }
 0x1da   : > { %670 = vst.msk [vmem:[#allocation3] sm:$0xff] %vm669_vm7, %v1408_v0 }
 0x1db   : > { %672 = vst.msk [vmem:[#allocation3] sm:$0xff] %vm671_vm8, %v1408_v0 }
 0x1e2   : > { %v674_v32 = vld [vmem:[#allocation3] sm:$0xff] }
 0x1e3   : > { %678 = vrot.lane.b32.xlu0 %v674_v32, %s1413_s16  ;;  %830 = vrot.lane.b32.xlu1 %v674_v32, %s1412_s15  ;;  %s1088_s16 = scalar_lea.hbm %s1644_s5, %s1192_s13  ;;  %s1330_s15 = scalar_lea.vmem %s1091_s25, 128 }
 0x1e4   : > { %1246 = vmatpush3.msra.mxu0 %v674_v32  ;;  %p1331_p12 = scmp.ne.s32.totalorder %s1091_s25, %s1330_s15 }
 0x1e5   : > { %1248 = vmatmul.mubr.msk.f32.vlgmr.msra.gmra.mxu0 %vm681_vm9, %v673_v33  ;;  %1255 = vmatprep.subr.mxu0 %v1408_v0 }
 0x1e6   : > { %1257 = vmatprep.mubr.msk.f32.mxu0 %vm1410_vm1, %v1408_v0  ;;  %p1332_p13 = pnand %p1331_p12, %p1487_p4 }
 0x1e7   : > { %909 = vrot.lane.b32.xlu0 %v674_v32, %s1414_s17  ;;  %988 = vrot.lane.b32.xlu1 %v674_v32, %s1415_s24  ;;  %s1416_s17 = smov [#allocation4]  }
 0x1e8   : > { %p1333_p0 = pneg %p1332_p13  ;;  %s1334_s24 = sshll.u32 %s1416_s17, 4  ;;  %s1335_s24 = int_to_ptr.vmem [resolvable:$false] %s1334_s24 }
 0x1e9   : > { %s1336_s21 = scalar_lea.vmem %s1335_s24, 256  ;;  %p1337_p1 = scmp.lt.s32.totalorder %s1091_s25, %s1335_s24 }
 0x1ea   : > { %p1338_p2 = scmp.lt.s32.totalorder %s1336_s21, %s1330_s15 }
 0x1eb   : > { %1068 = vperm.xlu0 %1329, %v1065_v34  }
 0x1ec   : > { %p1339_p3 = por %p1338_p2, %p1337_p1 }
 0x1ee   : > { %p1340_p5 = pnand %p1339_p3, %p1333_p0 }
 0x255   : > { %v679_v36 = vpop.permute.xlu0 %678  ;;  %v831_v37 = vpop.permute.xlu1 %830 }
 0x256   : > { %1241 = vmatpush3.msra.mxu1 %v679_v36 }
 0x257   : > { %1243 = vmatmul.mubr.msk.f32.vlgmr.msra.gmra.mxu1 %vm681_vm9, %v1182_v35  ;;  %1250 = vmatprep.subr.mxu1 %v1408_v0 }
 0x258   : > { %1251 = vmatpush3.msra.mxu1 %v831_v37  ;;  %1252 = vmatprep.mubr.msk.f32.mxu1 %vm1410_vm1, %v1408_v0 }
 0x259   : > { %v910_v40 = vpop.permute.xlu0 %909  ;;  %v989_v41 = vpop.permute.xlu1 %988  ;;  %1260 = vmatprep.subr.mxu1 %v1408_v0 }
 0x25a   : > { %1256 = vmatpush3.msra.mxu0 %v910_v40 }
 0x25b   : > { %1253 = vmatmul.mubr.msk.f32.vlgmr.msra.gmra.mxu1 %vm681_vm9, %v1185_v38  ;;  %1258 = vmatmul.mubr.msk.f32.vlgmr.msra.gmra.mxu0 %vm681_vm9, %v1187_v39 }
 0x25c   : > { %1261 = vmatpush3.msra.mxu1 %v989_v41  ;;  %1262 = vmatprep.mubr.msk.f32.mxu1 %vm1410_vm1, %v1408_v0 }
 0x25f   : > { %1263 = vmatmul.mubr.msk.f32.vlgmr.msra.gmra.mxu1 %vm681_vm9, %v1189_v42 }
 0x266   : > { %v1069_v55 = vpop.permute.xlu0 %1068 }
 0x2a5   : > { %v824_v43 = vpop.f32.mrf.mxu0 }
 0x2a7   : > { %v1249_v44 = vpop.f32.mrf.mxu0 }
 0x317   : > { %v751_v45 = vpop.f32.mrf.mxu1 }
 0x318   : > { %v825_v47 = vadd.f32 %v824_v43, %v751_v45 }
 0x319   : > { %v1244_v46 = vpop.f32.mrf.mxu1 }
 0x31b   : > { %v902_v48 = vpop.f32.mrf.mxu1  ;;  %v981_v49 = vpop.f32.mrf.mxu0 }
 0x31c   : > { %v906_v50 = vadd.f32 %v902_v48, %v825_v47 }
 0x31d   : > { %v1254_v51 = vpop.f32.mrf.mxu1  ;;  %v1259_v52 = vpop.f32.mrf.mxu0 }
 0x31e   : > { %v985_v53 = vadd.f32 %v981_v49, %v906_v50 }
 0x31f   : > { %v1060_v54 = vpop.f32.mrf.mxu1 }
 0x320   : > { %v1064_v56 = vadd.f32 %v1060_v54, %v985_v53 }
 0x321   : > { %v1264_v57 = vpop.f32.mrf.mxu1 }
 0x322   : > { %v1071_v58 = vadd.f32 %v1069_v55, %v1064_v56 }
 0x324   : > { %v1072_v59 = vmax.f32 %v1071_v58, 0.0 }
 0x326   : > { %1074 = vst.msk [vmem:[%s237_s14] sm:$0xff] %vm1073_vm10, %v1072_v59 }
 0x327   : > { %1343 = shalt.err (!%p1340_p5)
}
 0x328   : > { %s1344_s8 = scalar_lea.hbm %s1088_s16, 128  ;;  %s1348_s11 = scalar_lea.hbm %s1644_s5, 256 }
 0x329   : > { %p1345_p6 = scmp.ne.s32.totalorder %s1088_s16, %s1344_s8  ;;  %p1349_p10 = scmp.lt.s32.totalorder %s1088_s16, %s1644_s5 }
 0x32a   : > { %p1350_p11 = scmp.lt.s32.totalorder %s1348_s11, %s1344_s8 }
 0x32b   : > { %p1346_p7 = pnand %p1345_p6, %p1487_p4 }
 0x32c   : > { %p1351_p12 = por %p1350_p11, %p1349_p10 }
 0x32d   : > { %p1347_p9 = pneg %p1346_p7 }
 0x32f   : > { %p1352_p13 = pnand %p1351_p12, %p1347_p9 }
 0x331   : > { %1355 = shalt.err (!%p1352_p13)
}
 0x332   : > { %1265 = dma.vmem_to_hbm [thread:$0]  (%p1487_p4), %s1091_s25, 128, %s1088_s16, %s1076_s7  }
 0x333 PF: > { %p1271_p0 = scmp.ge.s32.totalorder %s1406_s23, 2  ;;  %s1102_s14 = sand.u32 1, %s1386_s18  }
 0x334   : > { %s1103_s27 = scalar_lea.sflag [#allocation5], %s1102_s14 }
 0x335   : > { %p1268_p1 = pnand %p1271_p0, %p1494_p8 }
 0x337   : > { %p1269_p2 = pneg %p1268_p1 }
 0x339   : > { %1381 = dma.done.wait (%p1269_p2), %s1103_s27, 128  }
 0x33a   : > { %1383 = vsyncadd (%p1269_p2), %s1103_s27, 4294967168  ;;  %s18_s23 = sadd.s32 1, %s1406_s23   ;;  %s1647_s18 = smov %s1390_s19 }
 0x33b   : > { %p15_p3 = scmp.ge.s32.totalorder %s18_s23, 4   ;;  %s1648_s19 = smov %s1394_s20 }
 0x33c   : > { %s1649_s20 = smov %s1500_s6  ;;  %s1650_s21 = smov %s1402_s22 }
 0x33d   : > { %s1651_s22 = smov %s1653_s26  ;;  %17 = sbr.rel (!%p15_p3) target bundleno = 4 (0x4), region = 87 }
 0x342   :  { %1108 = vsyncpa [#allocation5], 1 }
 0x343   :  { %1110 = vsyncpa [#allocation5 + $0x1], 1 }

</bundles_post_ra>
